<compile_context>
chip_gen: v6e
topology: v6e:2x2x1
jax: 0.10.0
libtpu: 0.0.40
codegen_flags: <defaults>
</compile_context>

<pallas_src>
import functools
import math

import jax
import jax.numpy as jnp
from jax.experimental import pallas as pl
from jax.experimental.pallas import tpu as pltpu


# ---------------------------------------------------------------------------
# Pallas kernel: full batch in a single grid step
# ---------------------------------------------------------------------------
def _fde_kernel(x_ref, dft_ref, convw_ref, convb_ref, sel_ref, projw_ref,
                projb_ref, gamma_ref, beta_ref, o_ref, *, B, S, T, eps):
    # ----- DFT magnitudes of the first n_freq_bands bins (one matmul each) ----
    x = x_ref[...]                                                   # (B*S, P)
    re = jnp.dot(x, dft_ref[0], preferred_element_type=jnp.float32)  # (B*S, F)
    im = jnp.dot(x, dft_ref[1], preferred_element_type=jnp.float32)  # (B*S, F)
    mag = jnp.sqrt(re * re + im * im)                                # (B*S, F)
    F = mag.shape[1]

    # ----- per-(t, c) normalization by max over (batch, freq bands) ----------
    mrow = jnp.max(mag, axis=1, keepdims=True)                       # (B*S, 1)
    mx = mrow[0:S, :]
    for b in range(1, B):
        mx = jnp.maximum(mx, mrow[b * S:(b + 1) * S, :])             # (S, 1)
    scale_s = jnp.where(mx > 0.0, 1.0 / jnp.maximum(mx, 1e-30), 1.0)
    scale = jnp.concatenate([scale_s] * B, axis=0)                   # (B*S, 1)
    mag = mag * scale

    # ----- Conv1d(in=F, out=O, k=3, pad=1) along the stacked S axis ----------
    s_idx = jax.lax.broadcasted_iota(jnp.int32, (B * S, 1), 0) % S
    zrow = jnp.zeros((1, F), jnp.float32)
    prev = jnp.concatenate([zrow, mag[:-1, :]], axis=0)
    prev = jnp.where(s_idx == 0, 0.0, prev)                          # batch edge
    nxt = jnp.concatenate([mag[1:, :], zrow], axis=0)
    nxt = jnp.where(s_idx == S - 1, 0.0, nxt)                        # batch edge
    conv = (jnp.dot(prev, convw_ref[0], preferred_element_type=jnp.float32)
            + jnp.dot(mag, convw_ref[1], preferred_element_type=jnp.float32)
            + jnp.dot(nxt, convw_ref[2], preferred_element_type=jnp.float32)
            + convb_ref[...])                                        # (B*S, O)

    # ----- (B,S,O) -> (B,C,T*O) regroup + Linear, fused via selector matmuls --
    # feats[b*C + r, k*O + o] = conv[b*S + r*T + k, o]
    y = None
    for k in range(T):
        g = jnp.dot(sel_ref[k], conv, preferred_element_type=jnp.float32)   # (B*C, O)
        ck = jnp.dot(g, projw_ref[k], preferred_element_type=jnp.float32)   # (B*C, DIM)
        y = ck if y is None else y + ck
    y = y + projb_ref[...]                                           # (B*C, DIM)

    # ----- LayerNorm over the last dim ---------------------------------------
    mu = jnp.mean(y, axis=1, keepdims=True)
    d = y - mu
    var = jnp.mean(d * d, axis=1, keepdims=True)
    o_ref[...] = d * jax.lax.rsqrt(var + eps) * gamma_ref[...] + beta_ref[...]


# ---------------------------------------------------------------------------
# Wrapper: weight prep (wrapper-side folding) + pallas_call
# ---------------------------------------------------------------------------
def frequency_domain_embedding(x, params, n_freq_bands=10):
    """x: (batch, types, channels, sampling_point) with types == in_channels."""
    conv_w, conv_b, proj_w, proj_b, gamma, beta = params
    B, T, C, P = x.shape
    F = n_freq_bands
    O = conv_w.shape[0]
    DIM = proj_w.shape[0]
    S = T * C
    assert proj_w.shape[1] == T * O, "proj expects in_channels == types"

    # DFT basis for the first F bins: X[k] = sum_p x[p] * exp(-2i*pi*k*p/P)
    pp = jnp.arange(P, dtype=jnp.float32)[:, None]
    kk = jnp.arange(F, dtype=jnp.float32)[None, :]
    ang = (2.0 * math.pi / P) * pp * kk
    dft = jnp.stack([jnp.cos(ang), -jnp.sin(ang)], axis=0)           # (2, P, F)

    # Conv1d taps: one (F, O) matrix per tap k (W[o, f, k] -> [k][f, o]).
    convw = jnp.transpose(conv_w, (2, 1, 0)).astype(jnp.float32)     # (3, F, O)
    convb = conv_b.reshape(1, O).astype(jnp.float32)

    # 0/1 selectors folding the (B, S, O) -> (B, C, T*O) reshape into matmuls.
    ii = jnp.arange(B * C)
    base = (ii // C) * S + (ii % C) * T                              # (B*C,)
    cols = base[None, :] + jnp.arange(T)[:, None]                    # (T, B*C)
    sel = jax.nn.one_hot(cols, B * S, dtype=jnp.float32)             # (T, B*C, B*S)

    # Linear weight split per k: Wk[o, d] = proj_w[d, k*O + o].
    projw = jnp.transpose(proj_w).reshape(T, O, DIM).astype(jnp.float32)  # (T, O, DIM)
    projb = proj_b.reshape(1, DIM).astype(jnp.float32)
    gamma2 = gamma.reshape(1, DIM).astype(jnp.float32)
    beta2 = beta.reshape(1, DIM).astype(jnp.float32)

    x_flat = x.reshape(B * S, P).astype(jnp.float32)                 # rows: b*S + (t*C + c)

    inputs = (x_flat, dft, convw, convb, sel, projw, projb, gamma2, beta2)
    in_specs = [pl.BlockSpec(a.shape, lambda g, nd=a.ndim: (0,) * nd)
                for a in inputs]
    kernel = functools.partial(_fde_kernel, B=B, S=S, T=T, eps=1e-5)

    out = pl.pallas_call(
        kernel,
        out_shape=jax.ShapeDtypeStruct((B * C, DIM), jnp.float32),
        grid_spec=pltpu.PrefetchScalarGridSpec(
            num_scalar_prefetch=0,
            grid=(1,),
            in_specs=in_specs,
            out_specs=pl.BlockSpec((B * C, DIM), lambda g: (0, 0)),
        ),
        compiler_params=pltpu.CompilerParams(
            dimension_semantics=("arbitrary",)),
    )(*inputs)
    return out.reshape(B, C, DIM)


# ---------------------------------------------------------------------------
# Pure-JAX reference (mirrors the PyTorch forward semantics)
# ---------------------------------------------------------------------------
def _reference(x, params, n_freq_bands):
    conv_w, conv_b, proj_w, proj_b, gamma, beta = params
    B, T, C, P = x.shape
    F = n_freq_bands
    O = conv_w.shape[0]
    S = T * C
    hp = jax.lax.Precision.HIGHEST

    sig = x.reshape(B, S, P)
    mags = jnp.abs(jnp.fft.fft(sig, axis=-1)[:, :, :F]).astype(jnp.float32)
    mx = jnp.max(mags, axis=(0, 2), keepdims=True)                   # per (t, c)
    mags = mags / jnp.where(mx > 0.0, mx, 1.0)

    pad = jnp.pad(mags, ((0, 0), (1, 1), (0, 0)))
    conv = jnp.zeros((B, S, O), jnp.float32) + conv_b[None, None, :]
    for k in range(3):
        conv = conv + jnp.einsum('bsf,of->bso', pad[:, k:k + S, :],
                                 conv_w[:, :, k], precision=hp)

    feats = conv.reshape(B, C, T * O)
    y = jnp.einsum('bcj,dj->bcd', feats, proj_w, precision=hp) + proj_b
    mu = jnp.mean(y, axis=-1, keepdims=True)
    var = jnp.mean((y - mu) ** 2, axis=-1, keepdims=True)
    return (y - mu) * jax.lax.rsqrt(var + 1e-5) * gamma + beta


if __name__ == "__main__":
    key = jax.random.PRNGKey(0)
    kx, kcw, kcb, kpw, kpb, kg, kb = jax.random.split(key, 7)

    # batch=2, types(=in_channels)=4, channels=4, sampling_point=16
    B, T, C, P = 2, 4, 4, 16
    O, DIM, F = 8, 32, 10          # out_channels, dim, n_freq_bands

    x = jax.random.normal(kx, (B, T, C, P), jnp.float32)
    conv_w = jax.random.normal(kcw, (O, F, 3), jnp.float32) / math.sqrt(F * 3)
    conv_b = 0.1 * jax.random.normal(kcb, (O,), jnp.float32)
    proj_w = jax.random.normal(kpw, (DIM, T * O), jnp.float32) / math.sqrt(T * O)
    proj_b = 0.1 * jax.random.normal(kpb, (DIM,), jnp.float32)
    gamma = 1.0 + 0.1 * jax.random.normal(kg, (DIM,), jnp.float32)
    beta = 0.1 * jax.random.normal(kb, (DIM,), jnp.float32)
    params = (conv_w, conv_b, proj_w, proj_b, gamma, beta)

    out = frequency_domain_embedding(x, params, n_freq_bands=F)
    out = jax.block_until_ready(out)

    ref = _reference(x, params, n_freq_bands=F)
    assert out.shape == (B, C, DIM)
    assert bool(jnp.all(jnp.isfinite(out)))
    err = float(jnp.max(jnp.abs(out - ref)))
    assert bool(jnp.allclose(out, ref, atol=2e-2, rtol=2e-2)), f"max abs diff {err}"

    print("KERNEL_OK")
</pallas_src>

<mosaic_0001>
module attributes {stable_mosaic.version = 11 : i64} {
  func.func @_fde_kernel(%arg0: i32, %arg1: memref<32x16xf32, #tpu.memory_space<vmem>>, %arg2: memref<2x16x10xf32, #tpu.memory_space<vmem>>, %arg3: memref<3x10x8xf32, #tpu.memory_space<vmem>>, %arg4: memref<1x8xf32, #tpu.memory_space<vmem>>, %arg5: memref<4x8x32xf32, #tpu.memory_space<vmem>>, %arg6: memref<4x8x32xf32, #tpu.memory_space<vmem>>, %arg7: memref<1x32xf32, #tpu.memory_space<vmem>>, %arg8: memref<1x32xf32, #tpu.memory_space<vmem>>, %arg9: memref<1x32xf32, #tpu.memory_space<vmem>>, %arg10: memref<8x32xf32, #tpu.memory_space<vmem>>) attributes {dimension_semantics = [#tpu.dimension_semantics<arbitrary>], iteration_bounds = array<i64: 1>, scalar_prefetch = 0 : i64, scratch_operands = 0 : i64, tpu.core_type = #tpu.core_type<tc>, window_params = [{pipeline_mode = #tpu.pipeline_mode<synchronous>, transform_indices = @transform_0, window_bounds = array<i64: 32, 16>}, {pipeline_mode = #tpu.pipeline_mode<synchronous>, transform_indices = @transform_1, window_bounds = array<i64: 2, 16, 10>}, {pipeline_mode = #tpu.pipeline_mode<synchronous>, transform_indices = @transform_2, window_bounds = array<i64: 3, 10, 8>}, {pipeline_mode = #tpu.pipeline_mode<synchronous>, transform_indices = @transform_3, window_bounds = array<i64: 1, 8>}, {pipeline_mode = #tpu.pipeline_mode<synchronous>, transform_indices = @transform_4, window_bounds = array<i64: 4, 8, 32>}, {pipeline_mode = #tpu.pipeline_mode<synchronous>, transform_indices = @transform_5, window_bounds = array<i64: 4, 8, 32>}, {pipeline_mode = #tpu.pipeline_mode<synchronous>, transform_indices = @transform_6, window_bounds = array<i64: 1, 32>}, {pipeline_mode = #tpu.pipeline_mode<synchronous>, transform_indices = @transform_7, window_bounds = array<i64: 1, 32>}, {pipeline_mode = #tpu.pipeline_mode<synchronous>, transform_indices = @transform_8, window_bounds = array<i64: 1, 32>}, {pipeline_mode = #tpu.pipeline_mode<synchronous>, transform_indices = @transform_9, window_bounds = array<i64: 8, 32>}]} {
    %c0 = arith.constant 0 : index
    %c0_0 = arith.constant 0 : index
    %0 = vector.load %arg1[%c0, %c0_0] : memref<32x16xf32, #tpu.memory_space<vmem>>, vector<32x16xf32>
    %c0_1 = arith.constant 0 : index
    %c0_2 = arith.constant 0 : index
    %c0_3 = arith.constant 0 : index
    %1 = vector.load %arg2[%c0_1, %c0_2, %c0_3] : memref<2x16x10xf32, #tpu.memory_space<vmem>>, vector<1x16x10xf32>
    %2 = vector.shape_cast %1 : vector<1x16x10xf32> to vector<16x10xf32>
    %cst = arith.constant dense<0.000000e+00> : vector<32x10xf32>
    %3 = tpu.matmul %0, %2, %cst {dimension_numbers = #tpu.dot_dimension_numbers<[1], [0], [0], [1], [0, 0, 1, 1], [], []>} : vector<32x16xf32>, vector<16x10xf32>, vector<32x10xf32> -> vector<32x10xf32>
    %c1 = arith.constant 1 : index
    %c0_4 = arith.constant 0 : index
    %c0_5 = arith.constant 0 : index
    %4 = vector.load %arg2[%c1, %c0_4, %c0_5] : memref<2x16x10xf32, #tpu.memory_space<vmem>>, vector<1x16x10xf32>
    %5 = vector.shape_cast %4 : vector<1x16x10xf32> to vector<16x10xf32>
    %cst_6 = arith.constant dense<0.000000e+00> : vector<32x10xf32>
    %6 = tpu.matmul %0, %5, %cst_6 {dimension_numbers = #tpu.dot_dimension_numbers<[1], [0], [0], [1], [0, 0, 1, 1], [], []>} : vector<32x16xf32>, vector<16x10xf32>, vector<32x10xf32> -> vector<32x10xf32>
    %7 = arith.mulf %3, %3 : vector<32x10xf32>
    %8 = arith.mulf %6, %6 : vector<32x10xf32>
    %9 = arith.addf %7, %8 : vector<32x10xf32>
    %10 = math.sqrt %9 : vector<32x10xf32>
    %cst_7 = arith.constant dense<0xFF800000> : vector<32xf32>
    %11 = vector.multi_reduction <maximumf>, %10, %cst_7 [1] : vector<32x10xf32> to vector<32xf32>
    %12 = vector.shape_cast %11 : vector<32xf32> to vector<32x1xf32>
    %13 = vector.extract_strided_slice %12 {offsets = [0, 0], sizes = [16, 1], strides = [1, 1]} : vector<32x1xf32> to vector<16x1xf32>
    %14 = vector.extract_strided_slice %12 {offsets = [16, 0], sizes = [16, 1], strides = [1, 1]} : vector<32x1xf32> to vector<16x1xf32>
    %15 = arith.maximumf %13, %14 : vector<16x1xf32>
    %cst_8 = arith.constant 0.000000e+00 : f32
    %16 = vector.broadcast %cst_8 : f32 to vector<16x1xf32>
    %17 = arith.cmpf ogt, %15, %16 : vector<16x1xf32>
    %cst_9 = arith.constant 1.000000e-30 : f32
    %18 = vector.broadcast %cst_9 : f32 to vector<16x1xf32>
    %19 = arith.maximumf %15, %18 : vector<16x1xf32>
    %cst_10 = arith.constant 1.000000e+00 : f32
    %20 = vector.broadcast %cst_10 : f32 to vector<16x1xf32>
    %21 = arith.divf %20, %19 : vector<16x1xf32>
    %cst_11 = arith.constant 1.000000e+00 : f32
    %22 = vector.broadcast %cst_11 : f32 to vector<16x1xf32>
    %23 = arith.select %17, %21, %22 : vector<16x1xi1>, vector<16x1xf32>
    %24 = tpu.concatenate %23, %23 in 0 : vector<16x1xf32>, vector<16x1xf32> -> vector<32x1xf32>
    %25 = vector.broadcast %24 : vector<32x1xf32> to vector<32x10xf32>
    %26 = arith.mulf %10, %25 : vector<32x10xf32>
    %27 = tpu.iota {dimensions = array<i32: 0>} : vector<32x1xi32>
    %c16_i32 = arith.constant 16 : i32
    %c0_i32 = arith.constant 0 : i32
    %28 = arith.cmpi eq, %c16_i32, %c0_i32 : i32
    %c1_i32 = arith.constant 1 : i32
    %29 = arith.select %28, %c1_i32, %c16_i32 : i32
    %30 = vector.broadcast %29 : i32 to vector<32x1xi32>
    %31 = arith.remsi %27, %30 : vector<32x1xi32>
    %c0_i32_12 = arith.constant 0 : i32
    %32 = vector.broadcast %c0_i32_12 : i32 to vector<32x1xi32>
    %33 = arith.cmpi ne, %31, %32 : vector<32x1xi32>
    %c0_i32_13 = arith.constant 0 : i32
    %34 = vector.broadcast %c0_i32_13 : i32 to vector<32x1xi32>
    %35 = arith.cmpi slt, %31, %34 : vector<32x1xi32>
    %c0_i32_14 = arith.constant 0 : i32
    %36 = arith.cmpi slt, %29, %c0_i32_14 : i32
    %37 = vector.broadcast %36 : i1 to vector<32x1xi1>
    %38 = vector.broadcast %37 : vector<32x1xi1> to vector<32x1xi1>
    %39 = arith.xori %35, %38 : vector<32x1xi1>
    %40 = arith.andi %39, %33 : vector<32x1xi1>
    %41 = vector.broadcast %29 : i32 to vector<32x1xi32>
    %42 = arith.addi %31, %41 : vector<32x1xi32>
    %43 = arith.select %40, %42, %31 : vector<32x1xi1>, vector<32x1xi32>
    %cst_15 = arith.constant 0.000000e+00 : f32
    %44 = vector.broadcast %cst_15 : f32 to vector<1x10xf32>
    %45 = vector.extract_strided_slice %26 {offsets = [0, 0], sizes = [31, 10], strides = [1, 1]} : vector<32x10xf32> to vector<31x10xf32>
    %46 = tpu.concatenate %44, %45 in 0 : vector<1x10xf32>, vector<31x10xf32> -> vector<32x10xf32>
    %c0_i32_16 = arith.constant 0 : i32
    %47 = vector.broadcast %c0_i32_16 : i32 to vector<32x1xi32>
    %48 = arith.cmpi eq, %43, %47 : vector<32x1xi32>
    %cst_17 = arith.constant 0.000000e+00 : f32
    %49 = vector.shape_cast %48 : vector<32x1xi1> to vector<32x1xi1>
    %50 = vector.broadcast %49 : vector<32x1xi1> to vector<32x10xi1>
    %51 = vector.broadcast %cst_17 : f32 to vector<32x10xf32>
    %52 = arith.select %50, %51, %46 : vector<32x10xi1>, vector<32x10xf32>
    %53 = vector.extract_strided_slice %26 {offsets = [1, 0], sizes = [31, 10], strides = [1, 1]} : vector<32x10xf32> to vector<31x10xf32>
    %54 = tpu.concatenate %53, %44 in 0 : vector<31x10xf32>, vector<1x10xf32> -> vector<32x10xf32>
    %c15_i32 = arith.constant 15 : i32
    %55 = vector.broadcast %c15_i32 : i32 to vector<32x1xi32>
    %56 = arith.cmpi eq, %43, %55 : vector<32x1xi32>
    %cst_18 = arith.constant 0.000000e+00 : f32
    %57 = vector.shape_cast %56 : vector<32x1xi1> to vector<32x1xi1>
    %58 = vector.broadcast %57 : vector<32x1xi1> to vector<32x10xi1>
    %59 = vector.broadcast %cst_18 : f32 to vector<32x10xf32>
    %60 = arith.select %58, %59, %54 : vector<32x10xi1>, vector<32x10xf32>
    %c0_19 = arith.constant 0 : index
    %c0_20 = arith.constant 0 : index
    %c0_21 = arith.constant 0 : index
    %61 = vector.load %arg3[%c0_19, %c0_20, %c0_21] : memref<3x10x8xf32, #tpu.memory_space<vmem>>, vector<1x10x8xf32>
    %62 = vector.shape_cast %61 : vector<1x10x8xf32> to vector<10x8xf32>
    %cst_22 = arith.constant dense<0.000000e+00> : vector<32x8xf32>
    %63 = tpu.matmul %52, %62, %cst_22 {dimension_numbers = #tpu.dot_dimension_numbers<[1], [0], [0], [1], [0, 0, 1, 1], [], []>} : vector<32x10xf32>, vector<10x8xf32>, vector<32x8xf32> -> vector<32x8xf32>
    %c1_23 = arith.constant 1 : index
    %c0_24 = arith.constant 0 : index
    %c0_25 = arith.constant 0 : index
    %64 = vector.load %arg3[%c1_23, %c0_24, %c0_25] : memref<3x10x8xf32, #tpu.memory_space<vmem>>, vector<1x10x8xf32>
    %65 = vector.shape_cast %64 : vector<1x10x8xf32> to vector<10x8xf32>
    %cst_26 = arith.constant dense<0.000000e+00> : vector<32x8xf32>
    %66 = tpu.matmul %26, %65, %cst_26 {dimension_numbers = #tpu.dot_dimension_numbers<[1], [0], [0], [1], [0, 0, 1, 1], [], []>} : vector<32x10xf32>, vector<10x8xf32>, vector<32x8xf32> -> vector<32x8xf32>
    %67 = arith.addf %63, %66 : vector<32x8xf32>
    %c2 = arith.constant 2 : index
    %c0_27 = arith.constant 0 : index
    %c0_28 = arith.constant 0 : index
    %68 = vector.load %arg3[%c2, %c0_27, %c0_28] : memref<3x10x8xf32, #tpu.memory_space<vmem>>, vector<1x10x8xf32>
    %69 = vector.shape_cast %68 : vector<1x10x8xf32> to vector<10x8xf32>
    %cst_29 = arith.constant dense<0.000000e+00> : vector<32x8xf32>
    %70 = tpu.matmul %60, %69, %cst_29 {dimension_numbers = #tpu.dot_dimension_numbers<[1], [0], [0], [1], [0, 0, 1, 1], [], []>} : vector<32x10xf32>, vector<10x8xf32>, vector<32x8xf32> -> vector<32x8xf32>
    %71 = arith.addf %67, %70 : vector<32x8xf32>
    %c0_30 = arith.constant 0 : index
    %c0_31 = arith.constant 0 : index
    %72 = vector.load %arg4[%c0_30, %c0_31] : memref<1x8xf32, #tpu.memory_space<vmem>>, vector<1x8xf32>
    %73 = vector.broadcast %72 : vector<1x8xf32> to vector<32x8xf32>
    %74 = arith.addf %71, %73 : vector<32x8xf32>
    %c0_32 = arith.constant 0 : index
    %c0_33 = arith.constant 0 : index
    %c0_34 = arith.constant 0 : index
    %75 = vector.load %arg5[%c0_32, %c0_33, %c0_34] : memref<4x8x32xf32, #tpu.memory_space<vmem>>, vector<1x8x32xf32>
    %76 = vector.shape_cast %75 : vector<1x8x32xf32> to vector<8x32xf32>
    %cst_35 = arith.constant dense<0.000000e+00> : vector<8x8xf32>
    %77 = tpu.matmul %76, %74, %cst_35 {dimension_numbers = #tpu.dot_dimension_numbers<[1], [0], [0], [1], [0, 0, 1, 1], [], []>} : vector<8x32xf32>, vector<32x8xf32>, vector<8x8xf32> -> vector<8x8xf32>
    %c0_36 = arith.constant 0 : index
    %c0_37 = arith.constant 0 : index
    %c0_38 = arith.constant 0 : index
    %78 = vector.load %arg6[%c0_36, %c0_37, %c0_38] : memref<4x8x32xf32, #tpu.memory_space<vmem>>, vector<1x8x32xf32>
    %79 = vector.shape_cast %78 : vector<1x8x32xf32> to vector<8x32xf32>
    %cst_39 = arith.constant dense<0.000000e+00> : vector<8x32xf32>
    %80 = tpu.matmul %77, %79, %cst_39 {dimension_numbers = #tpu.dot_dimension_numbers<[1], [0], [0], [1], [0, 0, 1, 1], [], []>} : vector<8x8xf32>, vector<8x32xf32>, vector<8x32xf32> -> vector<8x32xf32>
    %c1_40 = arith.constant 1 : index
    %c0_41 = arith.constant 0 : index
    %c0_42 = arith.constant 0 : index
    %81 = vector.load %arg5[%c1_40, %c0_41, %c0_42] : memref<4x8x32xf32, #tpu.memory_space<vmem>>, vector<1x8x32xf32>
    %82 = vector.shape_cast %81 : vector<1x8x32xf32> to vector<8x32xf32>
    %cst_43 = arith.constant dense<0.000000e+00> : vector<8x8xf32>
    %83 = tpu.matmul %82, %74, %cst_43 {dimension_numbers = #tpu.dot_dimension_numbers<[1], [0], [0], [1], [0, 0, 1, 1], [], []>} : vector<8x32xf32>, vector<32x8xf32>, vector<8x8xf32> -> vector<8x8xf32>
    %c1_44 = arith.constant 1 : index
    %c0_45 = arith.constant 0 : index
    %c0_46 = arith.constant 0 : index
    %84 = vector.load %arg6[%c1_44, %c0_45, %c0_46] : memref<4x8x32xf32, #tpu.memory_space<vmem>>, vector<1x8x32xf32>
    %85 = vector.shape_cast %84 : vector<1x8x32xf32> to vector<8x32xf32>
    %cst_47 = arith.constant dense<0.000000e+00> : vector<8x32xf32>
    %86 = tpu.matmul %83, %85, %cst_47 {dimension_numbers = #tpu.dot_dimension_numbers<[1], [0], [0], [1], [0, 0, 1, 1], [], []>} : vector<8x8xf32>, vector<8x32xf32>, vector<8x32xf32> -> vector<8x32xf32>
    %87 = arith.addf %80, %86 : vector<8x32xf32>
    %c2_48 = arith.constant 2 : index
    %c0_49 = arith.constant 0 : index
    %c0_50 = arith.constant 0 : index
    %88 = vector.load %arg5[%c2_48, %c0_49, %c0_50] : memref<4x8x32xf32, #tpu.memory_space<vmem>>, vector<1x8x32xf32>
    %89 = vector.shape_cast %88 : vector<1x8x32xf32> to vector<8x32xf32>
    %cst_51 = arith.constant dense<0.000000e+00> : vector<8x8xf32>
    %90 = tpu.matmul %89, %74, %cst_51 {dimension_numbers = #tpu.dot_dimension_numbers<[1], [0], [0], [1], [0, 0, 1, 1], [], []>} : vector<8x32xf32>, vector<32x8xf32>, vector<8x8xf32> -> vector<8x8xf32>
    %c2_52 = arith.constant 2 : index
    %c0_53 = arith.constant 0 : index
    %c0_54 = arith.constant 0 : index
    %91 = vector.load %arg6[%c2_52, %c0_53, %c0_54] : memref<4x8x32xf32, #tpu.memory_space<vmem>>, vector<1x8x32xf32>
    %92 = vector.shape_cast %91 : vector<1x8x32xf32> to vector<8x32xf32>
    %cst_55 = arith.constant dense<0.000000e+00> : vector<8x32xf32>
    %93 = tpu.matmul %90, %92, %cst_55 {dimension_numbers = #tpu.dot_dimension_numbers<[1], [0], [0], [1], [0, 0, 1, 1], [], []>} : vector<8x8xf32>, vector<8x32xf32>, vector<8x32xf32> -> vector<8x32xf32>
    %94 = arith.addf %87, %93 : vector<8x32xf32>
    %c3 = arith.constant 3 : index
    %c0_56 = arith.constant 0 : index
    %c0_57 = arith.constant 0 : index
    %95 = vector.load %arg5[%c3, %c0_56, %c0_57] : memref<4x8x32xf32, #tpu.memory_space<vmem>>, vector<1x8x32xf32>
    %96 = vector.shape_cast %95 : vector<1x8x32xf32> to vector<8x32xf32>
    %cst_58 = arith.constant dense<0.000000e+00> : vector<8x8xf32>
    %97 = tpu.matmul %96, %74, %cst_58 {dimension_numbers = #tpu.dot_dimension_numbers<[1], [0], [0], [1], [0, 0, 1, 1], [], []>} : vector<8x32xf32>, vector<32x8xf32>, vector<8x8xf32> -> vector<8x8xf32>
    %c3_59 = arith.constant 3 : index
    %c0_60 = arith.constant 0 : index
    %c0_61 = arith.constant 0 : index
    %98 = vector.load %arg6[%c3_59, %c0_60, %c0_61] : memref<4x8x32xf32, #tpu.memory_space<vmem>>, vector<1x8x32xf32>
    %99 = vector.shape_cast %98 : vector<1x8x32xf32> to vector<8x32xf32>
    %cst_62 = arith.constant dense<0.000000e+00> : vector<8x32xf32>
    %100 = tpu.matmul %97, %99, %cst_62 {dimension_numbers = #tpu.dot_dimension_numbers<[1], [0], [0], [1], [0, 0, 1, 1], [], []>} : vector<8x8xf32>, vector<8x32xf32>, vector<8x32xf32> -> vector<8x32xf32>
    %101 = arith.addf %94, %100 : vector<8x32xf32>
    %c0_63 = arith.constant 0 : index
    %c0_64 = arith.constant 0 : index
    %102 = vector.load %arg7[%c0_63, %c0_64] : memref<1x32xf32, #tpu.memory_space<vmem>>, vector<1x32xf32>
    %103 = vector.broadcast %102 : vector<1x32xf32> to vector<8x32xf32>
    %104 = arith.addf %101, %103 : vector<8x32xf32>
    %cst_65 = arith.constant dense<0.000000e+00> : vector<8xf32>
    %105 = vector.multi_reduction <add>, %104, %cst_65 [1] : vector<8x32xf32> to vector<8xf32>
    %106 = vector.shape_cast %105 : vector<8xf32> to vector<8x1xf32>
    %cst_66 = arith.constant 3.200000e+01 : f32
    %107 = vector.broadcast %cst_66 : f32 to vector<8x1xf32>
    %108 = arith.divf %106, %107 : vector<8x1xf32>
    %109 = vector.broadcast %108 : vector<8x1xf32> to vector<8x32xf32>
    %110 = arith.subf %104, %109 : vector<8x32xf32>
    %111 = arith.mulf %110, %110 : vector<8x32xf32>
    %cst_67 = arith.constant dense<0.000000e+00> : vector<8xf32>
    %112 = vector.multi_reduction <add>, %111, %cst_67 [1] : vector<8x32xf32> to vector<8xf32>
    %113 = vector.shape_cast %112 : vector<8xf32> to vector<8x1xf32>
    %cst_68 = arith.constant 3.200000e+01 : f32
    %114 = vector.broadcast %cst_68 : f32 to vector<8x1xf32>
    %115 = arith.divf %113, %114 : vector<8x1xf32>
    %cst_69 = arith.constant 9.99999974E-6 : f32
    %116 = vector.broadcast %cst_69 : f32 to vector<8x1xf32>
    %117 = arith.addf %115, %116 : vector<8x1xf32>
    %118 = math.rsqrt %117 : vector<8x1xf32>
    %119 = vector.broadcast %118 : vector<8x1xf32> to vector<8x32xf32>
    %120 = arith.mulf %110, %119 : vector<8x32xf32>
    %c0_70 = arith.constant 0 : index
    %c0_71 = arith.constant 0 : index
    %121 = vector.load %arg8[%c0_70, %c0_71] : memref<1x32xf32, #tpu.memory_space<vmem>>, vector<1x32xf32>
    %122 = vector.broadcast %121 : vector<1x32xf32> to vector<8x32xf32>
    %123 = arith.mulf %120, %122 : vector<8x32xf32>
    %c0_72 = arith.constant 0 : index
    %c0_73 = arith.constant 0 : index
    %124 = vector.load %arg9[%c0_72, %c0_73] : memref<1x32xf32, #tpu.memory_space<vmem>>, vector<1x32xf32>
    %125 = vector.broadcast %124 : vector<1x32xf32> to vector<8x32xf32>
    %126 = arith.addf %123, %125 : vector<8x32xf32>
    %c0_74 = arith.constant 0 : index
    %c0_75 = arith.constant 0 : index
    %127 = vector.load %arg10[%c0_74, %c0_75] : memref<8x32xf32, #tpu.memory_space<vmem>>, vector<8x32xf32>
    tpu.vector_store %arg10[%c0_74, %c0_75], %126 {strides = array<i32>} : memref<8x32xf32, #tpu.memory_space<vmem>>, vector<8x32xf32>,
    return
  }
  func.func @transform_0(%arg0: i32) -> (i32, i32) {
    %c0_i32 = arith.constant 0 : i32
    %c0_i32_0 = arith.constant 0 : i32
    %c0_i32_1 = arith.constant 0 : i32
    return %c0_i32, %c0_i32_0 : i32, i32
  }
  func.func @transform_1(%arg0: i32) -> (i32, i32, i32) {
    %c0_i32 = arith.constant 0 : i32
    %c0_i32_0 = arith.constant 0 : i32
    %c0_i32_1 = arith.constant 0 : i32
    %c0_i32_2 = arith.constant 0 : i32
    return %c0_i32, %c0_i32_0, %c0_i32_1 : i32, i32, i32
  }
  func.func @transform_2(%arg0: i32) -> (i32, i32, i32) {
    %c0_i32 = arith.constant 0 : i32
    %c0_i32_0 = arith.constant 0 : i32
    %c0_i32_1 = arith.constant 0 : i32
    %c0_i32_2 = arith.constant 0 : i32
    return %c0_i32, %c0_i32_0, %c0_i32_1 : i32, i32, i32
  }
  func.func @transform_3(%arg0: i32) -> (i32, i32) {
    %c0_i32 = arith.constant 0 : i32
    %c0_i32_0 = arith.constant 0 : i32
    %c0_i32_1 = arith.constant 0 : i32
    return %c0_i32, %c0_i32_0 : i32, i32
  }
  func.func @transform_4(%arg0: i32) -> (i32, i32, i32) {
    %c0_i32 = arith.constant 0 : i32
    %c0_i32_0 = arith.constant 0 : i32
    %c0_i32_1 = arith.constant 0 : i32
    %c0_i32_2 = arith.constant 0 : i32
    return %c0_i32, %c0_i32_0, %c0_i32_1 : i32, i32, i32
  }
  func.func @transform_5(%arg0: i32) -> (i32, i32, i32) {
    %c0_i32 = arith.constant 0 : i32
    %c0_i32_0 = arith.constant 0 : i32
    %c0_i32_1 = arith.constant 0 : i32
    %c0_i32_2 = arith.constant 0 : i32
    return %c0_i32, %c0_i32_0, %c0_i32_1 : i32, i32, i32
  }
  func.func @transform_6(%arg0: i32) -> (i32, i32) {
    %c0_i32 = arith.constant 0 : i32
    %c0_i32_0 = arith.constant 0 : i32
    %c0_i32_1 = arith.constant 0 : i32
    return %c0_i32, %c0_i32_0 : i32, i32
  }
  func.func @transform_7(%arg0: i32) -> (i32, i32) {
    %c0_i32 = arith.constant 0 : i32
    %c0_i32_0 = arith.constant 0 : i32
    %c0_i32_1 = arith.constant 0 : i32
    return %c0_i32, %c0_i32_0 : i32, i32
  }
  func.func @transform_8(%arg0: i32) -> (i32, i32) {
    %c0_i32 = arith.constant 0 : i32
    %c0_i32_0 = arith.constant 0 : i32
    %c0_i32_1 = arith.constant 0 : i32
    return %c0_i32, %c0_i32_0 : i32, i32
  }
  func.func @transform_9(%arg0: i32) -> (i32, i32) {
    %c0_i32 = arith.constant 0 : i32
    %c0_i32_0 = arith.constant 0 : i32
    %c0_i32_1 = arith.constant 0 : i32
    return %c0_i32, %c0_i32_0 : i32, i32
  }
}

</mosaic_0001>

<bundles_post_ra>
// kernel: tpu_custom_call.1
= control target key start
LH: loop header
LB: loop body
LE: loop exit
PB: predicated region body
PF: predicated region fallthrough
CT: control target
= control target key end

     0   :  { %vm39_vm0 = vcmask 130048   ;;  %s1889_s0 = inlined_call_operand.vmem [shape: f32[32,16], index: 0, kind: input, shape index: {}]   ;;  %s1890_s1 = inlined_call_operand.vmem [shape: f32[2,16,10], index: 1, kind: input, shape index: {}]   ;;  %s1891_s2 = inlined_call_operand.vmem [shape: f32[3,10,8], index: 2, kind: input, shape index: {}]   ;;  %s1892_s3 = inlined_call_operand.vmem [shape: f32[1,8], index: 3, kind: input, shape index: {}]   ;;  %s1893_s4 = inlined_call_operand.vmem [shape: f32[4,8,32], index: 4, kind: input, shape index: {}]   ;;  %s1894_s5 = inlined_call_operand.vmem [shape: f32[4,8,32], index: 5, kind: input, shape index: {}]   ;;  %s1895_s6 = inlined_call_operand.vmem [shape: f32[1,32], index: 6, kind: input, shape index: {}]   ;;  %s1896_s7 = inlined_call_operand.vmem [shape: f32[1,32], index: 7, kind: input, shape index: {}]   ;;  %s1897_s8 = inlined_call_operand.vmem [shape: f32[1,32], index: 8, kind: input, shape index: {}]   ;;  %s1898_s9 = inlined_call_operand.hbm [shape: f32[8,32], index: 9, kind: output, shape index: {}]  }
   0x1   :  { %v38_v0 = vld [vmem:[%s1890_s1 + $0x8] sm:$0xff]  ;;  %v1399_v1 = vld [vmem:[%s1890_s1 + $0x18] sm:$0xff]  ;;  %v37_v2 = vld [vmem:[%s1890_s1] sm:$0xff] }
   0x2   :  { %1499 = vmatprep.subr.mxu0 %v38_v0  ;;  %1509 = vmatprep.subr.mxu1 %v1399_v1  ;;  %v1398_v3 = vld [vmem:[%s1890_s1 + $0x10] sm:$0xff]  ;;  %v33_v4 = vld [vmem:[%s1889_s0] sm:$0xff] }
   0x3   :  { %1500 = vmatpush3.msra.mxu0 %v38_v0  ;;  %1510 = vmatpush3.msra.mxu1 %v1399_v1 }
   0x4   :  { %14 = vsyncpa [#allocation3], 0  ;;  %1501 = vmatprep.subr.mxu0 %v37_v2  ;;  %1511 = vmatprep.subr.mxu1 %v1398_v3  ;;  %v34_v5 = vld [vmem:[%s1889_s0 + $0x8] sm:$0xff]  ;;  %v35_v6 = vld [vmem:[%s1889_s0 + $0x10] sm:$0xff]  ;;  %vm265_vm2 = vcmask 80896   ;;  %v1655_v52 = vmov 0  }
   0x5   :  { %1502 = vmatpush3.msra.mxu0 %v37_v2  ;;  %1503 = vmatprep.mubr.msk.f32.mxu0 %vm39_vm0, %v33_v4  ;;  %v36_v7 = vld [vmem:[%s1889_s0 + $0x18] sm:$0xff]  ;;  %vm432_vm10 = vcmask 1041408   ;;  %v1404_v63 = vld [vmem:[%s1891_s2 + $0x10] sm:$0xff]  ;;  %vm361_vm13 = vcmask 1040384   ;;  %s1658_s10 = smov [#allocation2]  }
   0x6   :  { %1512 = vmatpush3.msra.mxu1 %v1398_v3  ;;  %1513 = vmatprep.mubr.msk.f32.mxu1 %vm39_vm0, %v33_v4  ;;  %v1405_v53 = vld [vmem:[%s1891_s2 + $0x18] sm:$0x3]  ;;  %v420_v3 = vld [vmem:[%s1891_s2 + $0x8] sm:$0x3]  ;;  %s1386_s11 = sshll.u32 %s1658_s10, 4  ;;  %s1387_s11 = int_to_ptr.vmem [resolvable:$true] %s1386_s11 }
   0x7   :  { %1504 = vmatmul.mubr.msk.f32.vlgmr.msra.gmra.mxu0 %vm39_vm0, %v34_v5  ;;  %1514 = vmatmul.mubr.msk.f32.vlgmr.msra.gmra.mxu1 %vm39_vm0, %v34_v5  ;;  %v1417_v4 = vld [vmem:[%s1891_s2 + $0x28] sm:$0x3]  ;;  %v419_v5 = vld [vmem:[%s1891_s2] sm:$0xff]  ;;  %s1633_s12 = scalar_lea.vmem %s1387_s11, 128  ;;  %p1638_p1 = scmp.lt.s32.totalorder %s1387_s11, %s1387_s11 }
   0x8   :  { %1506 = vmatprep.mubr.msk.f32.mxu0 %vm39_vm0, %v35_v6  ;;  %1516 = vmatprep.mubr.msk.f32.mxu1 %vm39_vm0, %v35_v6  ;;  %v304_v6 = vlaneseq  ;;  %p1634_p0 = scmp.ne.s32.totalorder %s1387_s11, %s1633_s12  ;;  %p1639_p2 = scmp.lt.s32.totalorder %s1633_s12, %s1633_s12 }
   0x9   :  { %1618 = vset.pattern.permute.xlu1 %v1655_v52  ;;  %1617 = vset.pattern.permute.xlu0 %v1655_v52 }
   0xa   :  { %1519 = vmatprep.subr.msk.mxu0 %vm432_vm10, %v1405_v53  ;;  %1529 = vmatprep.subr.msk.mxu1 %vm432_vm10, %v420_v3  ;;  %p1640_p3 = por %p1639_p2, %p1638_p1 }
   0xb   :  { %1507 = vmatmul.mubr.msk.f32.gmra.mxu0 %vm39_vm0, %v36_v7  ;;  %1517 = vmatmul.mubr.msk.f32.gmra.mxu1 %vm39_vm0, %v36_v7  ;;  %v305_v7 = vshrl.u32 %v304_v6, 7  ;;  %vm390_vm0 = vcmask 1046528   ;;  %v739_v6 = vld [vmem:[%s1893_s4] sm:$0xff] }
   0xc   :  { %1520 = vmatpush3.msk.msra.mxu0 %vm432_vm10, %v1405_v53  ;;  %1530 = vmatpush3.msk.msra.mxu1 %vm432_vm10, %v420_v3  ;;  %p1641_p4 = pnand %p1640_p3, %p1634_p0 }
   0xd   :  { %1521 = vmatprep.subr.mxu0 %v1404_v63  ;;  %1531 = vmatprep.subr.mxu1 %v419_v5 }
   0xe   :  { %1522 = vmatpush3.msra.mxu0 %v1404_v63  ;;  %1532 = vmatpush3.msra.mxu1 %v419_v5  ;;  %v1425_v5 = vld [vmem:[%s1893_s4 + $0x8] sm:$0xff] }
   0xf   :  { %1539 = vmatprep.subr.msk.mxu0 %vm432_vm10, %v1417_v4 }
  0xc7   :  { %v1505_v8 = vpop.f32.mrf.mxu0  ;;  %v1515_v9 = vpop.f32.mrf.mxu1 }
  0xc8   :  { %v226_v10 = vmul.f32 %v1505_v8, %v1505_v8  ;;  %v230_v11 = vmul.f32 %v1515_v9, %v1515_v9  ;;  %v307_v9 = vadd.s32 16, %v305_v7 }
  0xc9   :  { %v118_v12 = vpop.f32.mrf.mxu0  ;;  %v206_v13 = vpop.f32.mrf.mxu1 }
  0xca   :  { %v234_v14 = vadd.f32 %v230_v11, %v226_v10  ;;  %v225_v15 = vmul.f32 %v118_v12, %v118_v12  ;;  %v229_v16 = vmul.f32 %v206_v13, %v206_v13  ;;  %v306_v10 = vadd.s32 8, %v305_v7 }
  0xcb   :  { %v1508_v17 = vpop.f32.mrf.mxu0  ;;  %v1518_v18 = vpop.f32.mrf.mxu1  ;;  %v313_v13 = vand.u32 15, %v305_v7 }
  0xcc   :  { %1619 = vrsqrt.f32 %v234_v14  ;;  %v233_v19 = vadd.f32 %v229_v16, %v225_v15  ;;  %v228_v20 = vmul.f32 %v1508_v17, %v1508_v17  ;;  %v232_v21 = vmul.f32 %v1518_v18, %v1518_v18 }
  0xcd   :  { %v128_v22 = vpop.f32.mrf.mxu0  ;;  %v216_v23 = vpop.f32.mrf.mxu1  ;;  %vm246_vm1 = vcmp.eq.f32.partialorder %v234_v14, inf  ;;  %v249_v31 = vand.u32 2147483648, %v234_v14  ;;  %vm248_vm3 = vcmp.eq.f32.partialorder %v234_v14, 0.0  ;;  %v327_v16 = vand.u32 15, %v307_v9  ;;  %v814_v9 = vld [vmem:[%s1894_s5] sm:$0xff] }
  0xce   :  { %1621 = vrsqrt.f32 %v233_v19  ;;  %v236_v24 = vadd.f32 %v232_v21, %v228_v20  ;;  %v227_v25 = vmul.f32 %v128_v22, %v128_v22  ;;  %v231_v26 = vmul.f32 %v216_v23, %v216_v23  ;;  %v1416_v22 = vld [vmem:[%s1891_s2 + $0x20] sm:$0xff] }
  0xcf   :  { %vm239_vm4 = vcmp.eq.f32.partialorder %v233_v19, inf  ;;  %v242_v36 = vand.u32 2147483648, %v233_v19  ;;  %vm241_vm5 = vcmp.eq.f32.partialorder %v233_v19, 0.0  ;;  %v320_v17 = vand.u32 15, %v306_v10 }
  0xd0   :  { %1623 = vrsqrt.f32 %v236_v24  ;;  %v235_v27 = vadd.f32 %v231_v26, %v227_v25  ;;  %vm260_vm6 = vcmp.eq.f32.partialorder %v236_v24, inf  ;;  %v263_v42 = vand.u32 2147483648, %v236_v24 }
  0xd1   :  { %vm262_vm7 = vcmp.eq.f32.partialorder %v236_v24, 0.0  ;;  %v308_v18 = vadd.s32 24, %v305_v7  ;;  %vm374_vm14 = vcmp.eq.s32.totalorder %v313_v13, 0  ;;  %vm1782_vm15 = vcmp.eq.s32.totalorder %v327_v16, 0  ;;  %v1427_v7 = vld [vmem:[%s1894_s5 + $0x8] sm:$0xff] }
  0xd2   :  { %1625 = vrsqrt.f32 %v235_v27  ;;  %vm253_vm8 = vcmp.eq.f32.partialorder %v235_v27, inf  ;;  %v256_v47 = vand.u32 2147483648, %v235_v27  ;;  %vm255_vm9 = vcmp.eq.f32.partialorder %v235_v27, 0.0 }
  0xd9   :  { %v1620_v28 = vpop.eup %1619 }
  0xda   :  { %v245_v29 = vmul.f32 %v1620_v28, %v234_v14 }
  0xdb   :  { %v1622_v30 = vpop.eup %1621 }
  0xdc   :  { %v247_v32 = vsel %vm246_vm1, %v234_v14, %v245_v29  ;;  %v238_v33 = vmul.f32 %v1622_v30, %v233_v19  ;;  %vm404_vm1 = vcmp.eq.s32.totalorder %v320_v17, 15  ;;  %v1434_v17 = vld [vmem:[%s1893_s4 + $0x18] sm:$0xff] }
  0xdd   :  { %v1624_v34 = vpop.eup %1623  ;;  %v1741_v35 = vsel %vm248_vm3, %v249_v31, %v247_v32  ;;  %v334_v32 = vand.u32 15, %v308_v18  ;;  %v1436_v18 = vld [vmem:[%s1894_s5 + $0x18] sm:$0xff] }
  0xde   :  { %v269_v37 = vsel %vm265_vm2, %v1741_v35, -inf  ;;  %v240_v38 = vsel %vm239_vm4, %v233_v19, %v238_v33  ;;  %v259_v39 = vmul.f32 %v1624_v34, %v236_v24  ;;  %vm1657_vm4 = vmmov 0  }
  0xdf   :  { %v1626_v40 = vpop.eup %1625  ;;  %270 = vmax.xlane.f32.xlu1 %v269_v37  ;;  %v243_v41 = vsel %vm241_vm5, %v242_v36, %v240_v38  ;;  %vm406_vm3 = vcmp.eq.s32.totalorder %v334_v32, 15  ;;  %vm892_vm5 = vcmask 64512  }
  0xe0   :  { %v266_v43 = vsel %vm265_vm2, %v243_v41, -inf  ;;  %v261_v44 = vsel %vm260_vm6, %v236_v24, %v259_v39  ;;  %v252_v45 = vmul.f32 %v1626_v40, %v235_v27 }
  0xe1   :  { %267 = vmax.xlane.f32.xlu0 %v266_v43  ;;  %v1746_v46 = vsel %vm262_vm7, %v263_v42, %v261_v44  ;;  %v1656_v43 = vmov 0.0  }
  0xe2   :  { %v275_v48 = vsel %vm265_vm2, %v1746_v46, -inf  ;;  %v254_v49 = vsel %vm253_vm8, %v235_v27, %v252_v45  ;;  %1549 = vmatprep.subr.mxu1 %v1656_v43 }
  0xe3   :  { %276 = vmax.xlane.f32.xlu1 %v275_v48  ;;  %v257_v50 = vsel %vm255_vm9, %v256_v47, %v254_v49 }
  0xe4   :  { %v272_v51 = vsel %vm265_vm2, %v257_v50, -inf }
  0xe5   :  { %273 = vmax.xlane.f32.xlu0 %v272_v51 }
 0x168   :  { %v271_v54 = vpop.xlane.xlu1 %270 }
 0x16a   :  { %v268_v55 = vpop.xlane.xlu0 %267 }
 0x16c   :  { %v277_v56 = vpop.xlane.xlu1 %276 }
 0x16d   :  { %v279_v57 = vmax.f32 %v271_v54, %v277_v56 }
 0x16e   :  { %v274_v58 = vpop.xlane.xlu0 %273 }
 0x16f   :  { %v283_v59 = vmax.f32 %v279_v57, 1e-30  ;;  %v278_v60 = vmax.f32 %v268_v55, %v274_v58  ;;  %vm281_vm11 = vcmp.gt.f32.partialorder %v279_v57, 0.0 }
 0x171   :  { %1627 = vrcp.f32 %v283_v59  ;;  %v282_v61 = vmax.f32 %v278_v60, 1e-30  ;;  %vm280_vm12 = vcmp.gt.f32.partialorder %v278_v60, 0.0  ;;  %v1423_v59 = vld [vmem:[%s1892_s3] ss:$0 sm:$0xff] }
 0x173   :  { %1629 = vrcp.f32 %v282_v61 }
 0x17e   :  { %v1628_v62 = vpop.eup %1627 }
 0x17f   :  { %v289_v0 = vsel %vm281_vm11, %v1628_v62, 1.0 }
 0x180   :  { %v1630_v1 = vpop.eup %1629  ;;  %297 = vperm.xlu1 %1618, %v289_v0  }
 0x181   :  { %v288_v2 = vsel %vm280_vm12, %v1630_v1, 1.0 }
 0x182   :  { %292 = vperm.xlu0 %1617, %v288_v2  }
 0x1fb   :  { %v298_v8 = vpop.permute.xlu1 %297 }
 0x1fc   :  { %v301_v11 = vmul.f32 %v298_v8, %v1741_v35  ;;  %v303_v23 = vmul.f32 %v298_v8, %v1746_v46  ;;  %v1430_v8 = vld [vmem:[%s1893_s4 + $0x10] sm:$0xff] }
 0x1fd   :  { %v293_v12 = vpop.permute.xlu0 %292 }
 0x1fe   :  { %v300_v14 = vmul.f32 %v293_v12, %v243_v41  ;;  %v302_v15 = vmul.f32 %v293_v12, %v257_v50  ;;  %v363_v19 = vrot.slane %v301_v11, 7  ;;  %v392_v29 = vrot.slane %v301_v11, 1 }
 0x1ff   :  { %v396_v33 = vrot.slane %v303_v23, 1  ;;  %v367_v37 = vrot.slane %v303_v23, 7 }
 0x200   :  { %v362_v20 = vrot.slane %v300_v14, 7  ;;  %v365_v21 = vrot.slane %v302_v15, 7  ;;  %1523 = vmatprep.mubr.msk.f32.mxu0 %vm265_vm2, %v300_v14  ;;  %v391_v24 = vrot.slane %v300_v14, 1  ;;  %v394_v25 = vrot.slane %v302_v15, 1  ;;  %v1432_v14 = vld [vmem:[%s1894_s5 + $0x10] sm:$0xff] }
 0x201   :  { %1524 = vmatmul.mubr.msk.f32.vlgmr.msra.gmra.mxu0 %vm265_vm2, %v301_v11  ;;  %v402_v41 = vsel %vm390_vm0, %v396_v33, 0.0 }
 0x202   :  { %1526 = vmatprep.mubr.msk.f32.mxu0 %vm265_vm2, %v302_v15  ;;  %1540 = vmatpush3.msk.msra.mxu0 %vm432_vm10, %v1417_v4  ;;  %v373_v26 = vsel %vm361_vm13, 0.0, %v362_v20  ;;  %v366_v27 = vsel %vm361_vm13, %v363_v19, %v365_v21  ;;  %v364_v31 = vsel %vm361_vm13, %v362_v20, %v363_v19  ;;  %v393_v35 = vsel %vm390_vm0, %v391_v24, %v392_v29 }
 0x203   :  { %v386_v30 = vsel %vm374_vm14, 0.0, %v373_v26  ;;  %1541 = vmatprep.subr.mxu0 %v1416_v22  ;;  %v388_v34 = vsel %vm1782_vm15, 0.0, %v366_v27  ;;  %v395_v36 = vsel %vm390_vm0, %v392_v29, %v394_v25  ;;  %v368_v38 = vsel %vm361_vm13, %v365_v21, %v367_v37 }
 0x204   :  { %1533 = vmatprep.mubr.msk.f32.mxu1 %vm265_vm2, %v386_v30  ;;  %1542 = vmatpush3.msra.mxu0 %v1416_v22  ;;  %v416_v39 = vsel %vm404_vm1, 0.0, %v395_v36  ;;  %v397_v40 = vsel %vm390_vm0, %v394_v25, %v396_v33  ;;  %v418_v42 = vsel %vm406_vm3, 0.0, %v402_v41  ;;  %v1438_v30 = vld [vmem:[%s1895_s6] ss:$0 sm:$0xff] }
 0x205   :  { %1527 = vmatmul.mubr.msk.f32.gmra.mxu0 %vm265_vm2, %v303_v23  ;;  %1534 = vmatmul.mubr.msk.f32.vlgmr.msra.gmra.mxu1 %vm265_vm2, %v364_v31 }
 0x206   :  { %1536 = vmatprep.mubr.msk.f32.mxu1 %vm265_vm2, %v388_v34  ;;  %1543 = vmatprep.mubr.msk.f32.mxu0 %vm265_vm2, %v393_v35 }
 0x207   :  { %1560 = vmatprep.subr.mxu0 %v1656_v43 }
 0x209   :  { %1537 = vmatmul.mubr.msk.f32.gmra.mxu1 %vm265_vm2, %v368_v38  ;;  %1544 = vmatmul.mubr.msk.f32.vlgmr.msra.gmra.mxu0 %vm265_vm2, %v416_v39 }
 0x20a   :  { %1546 = vmatprep.mubr.msk.f32.mxu0 %vm265_vm2, %v397_v40  ;;  %1557 = vmatprep.mubr.msk.f32.mxu1 %vm1657_vm4, %v1656_v43 }
 0x20d   :  { %1547 = vmatmul.mubr.msk.f32.gmra.mxu0 %vm265_vm2, %v418_v42  ;;  %vm740_vm2 = vcmask 261120  }
 0x20e   :  { %1568 = vmatprep.mubr.msk.f32.mxu0 %vm1657_vm4, %v1656_v43 }
 0x2c1   :  { %v1525_v44 = vpop.f32.mrf.mxu0 }
 0x2c3   :  { %v502_v45 = vpop.f32.mrf.mxu0 }
 0x2c5   :  { %v1528_v46 = vpop.f32.mrf.mxu0  ;;  %v1535_v47 = vpop.f32.mrf.mxu1 }
 0x2c6   :  { %v608_v56 = vadd.f32 %v1535_v47, %v1525_v44  ;;  %v1439_v44 = vld [vmem:[%s1896_s7] ss:$0 sm:$0xff] }
 0x2c7   :  { %v512_v48 = vpop.f32.mrf.mxu0  ;;  %v602_v49 = vpop.f32.mrf.mxu1 }
 0x2c8   :  { %v603_v61 = vadd.f32 %v602_v49, %v502_v45 }
 0x2c9   :  { %v1538_v50 = vpop.f32.mrf.mxu1  ;;  %v1545_v51 = vpop.f32.mrf.mxu0 }
 0x2ca   :  { %v618_v54 = vadd.f32 %v1538_v50, %v1528_v46  ;;  %v725_v62 = vadd.f32 %v1545_v51, %v608_v56  ;;  %v1440_v46 = vld [vmem:[%s1897_s8] ss:$0 sm:$0xff] }
 0x2cb   :  { %v612_v52 = vpop.f32.mrf.mxu1  ;;  %v705_v53 = vpop.f32.mrf.mxu0 }
 0x2cc   :  { %v613_v57 = vadd.f32 %v612_v52, %v512_v48  ;;  %v724_v1 = vadd.f32 %v705_v53, %v603_v61  ;;  %v736_v3 = vadd.f32 %v1423_v59, %v725_v62 }
 0x2cd   :  { %v1548_v55 = vpop.f32.mrf.mxu0 }
 0x2ce   :  { %v727_v58 = vadd.f32 %v1548_v55, %v618_v54  ;;  %v735_v4 = vadd.f32 %v1423_v59, %v724_v1 }
 0x2cf   :  { %v715_v60 = vpop.f32.mrf.mxu0 }
 0x2d0   :  { %v738_v63 = vadd.f32 %v1423_v59, %v727_v58  ;;  %v726_v0 = vadd.f32 %v715_v60, %v613_v57 }
 0x2d2   :  { %v737_v2 = vadd.f32 %v1423_v59, %v726_v0  ;;  %1550 = vmatpush3.msra.mxu1 %v738_v63  ;;  %1561 = vmatpush3.msra.mxu0 %v738_v63 }
 0x2d3   :  { %1551 = vmatprep.subr.mxu1 %v1656_v43  ;;  %1562 = vmatprep.subr.mxu0 %v1656_v43 }
 0x2d4   :  { %1552 = vmatpush3.msra.mxu1 %v737_v2  ;;  %1563 = vmatpush3.msra.mxu0 %v737_v2 }
 0x2d5   :  { %1553 = vmatprep.subr.mxu1 %v1656_v43  ;;  %1564 = vmatprep.subr.mxu0 %v1656_v43 }
 0x2d6   :  { %1554 = vmatpush3.msra.mxu1 %v736_v3  ;;  %1565 = vmatpush3.msra.mxu0 %v736_v3 }
 0x2d7   :  { %1555 = vmatprep.subr.mxu1 %v1656_v43  ;;  %1566 = vmatprep.subr.mxu0 %v1656_v43 }
 0x2d8   :  { %1556 = vmatpush3.msra.mxu1 %v735_v4  ;;  %1567 = vmatpush3.msra.mxu0 %v735_v4 }
 0x2d9   :  { %1569 = vmatmul.mubr.msk.f32.vlgmr.msra.gmra.mxu0 %vm740_vm2, %v1425_v5  ;;  %1581 = vmatprep.subr.mxu0 %v1656_v43 }
 0x2da   :  { %1582 = vmatpush3.msra.mxu0 %v738_v63  ;;  %1558 = vmatmul.mubr.msk.f32.vlgmr.msra.gmra.mxu1 %vm740_vm2, %v739_v6 }
 0x2db   :  { %1583 = vmatprep.subr.mxu0 %v1656_v43  ;;  %1589 = vmatprep.mubr.msk.f32.mxu0 %vm1657_vm4, %v1656_v43 }
 0x2dc   :  { %1584 = vmatpush3.msra.mxu0 %v737_v2  ;;  %1571 = vmatprep.subr.mxu1 %v1656_v43 }
 0x2dd   :  { %1585 = vmatprep.subr.mxu0 %v1656_v43  ;;  %1572 = vmatpush3.msra.mxu1 %v1427_v7 }
 0x2de   :  { %1586 = vmatpush3.msra.mxu0 %v736_v3  ;;  %1573 = vmatprep.mubr.msk.f32.mxu1 %vm1657_vm4, %v1656_v43 }
 0x2df   :  { %1587 = vmatprep.subr.mxu0 %v1656_v43  ;;  %1576 = vmatprep.subr.mxu1 %v1656_v43 }
 0x2e0   :  { %1588 = vmatpush3.msra.mxu0 %v735_v4 }
 0x2e1   :  { %1590 = vmatmul.mubr.msk.f32.vlgmr.msra.gmra.mxu0 %vm740_vm2, %v1430_v8  ;;  %1608 = vmatprep.subr.mxu0 %v1656_v43 }
 0x2e2   :  { %1610 = vmatprep.mubr.msk.f32.mxu0 %vm1657_vm4, %v1656_v43  ;;  %1609 = vmatpush3.msra.mxu0 %v1436_v18 }
 0x399   :  { %v886_v10 = vpop.f32.mrf.mxu0 }
 0x39a   :  { %1574 = vmatmul.mubr.msk.f32.vlgmr.msra.gmra.mxu1 %vm892_vm5, %v886_v10  ;;  %v810_v11 = vpop.f32.mrf.mxu1 }
 0x39b   :  { %v1570_v12 = vpop.f32.mrf.mxu0  ;;  %1577 = vmatpush3.msra.mxu1 %v814_v9  ;;  %1578 = vmatprep.mubr.msk.f32.mxu1 %vm1657_vm4, %v1656_v43 }
 0x39c   :  { %v1559_v13 = vpop.f32.mrf.mxu1  ;;  %1592 = vmatprep.subr.mxu1 %v1656_v43 }
 0x39e   :  { %1579 = vmatmul.mubr.msk.f32.vlgmr.msra.gmra.mxu1 %vm892_vm5, %v810_v11 }
 0x39f   :  { %1593 = vmatpush3.msra.mxu1 %v1432_v14  ;;  %1594 = vmatprep.mubr.msk.f32.mxu1 %vm1657_vm4, %v1656_v43 }
 0x3a0   :  { %1597 = vmatprep.subr.mxu1 %v1656_v43 }
 0x3a1   :  { %v1110_v15 = vpop.f32.mrf.mxu0 }
 0x3a2   :  { %1595 = vmatmul.mubr.msk.f32.vlgmr.msra.gmra.mxu1 %vm892_vm5, %v1110_v15 }
 0x3a3   :  { %1598 = vmatpush3.msra.mxu1 %v738_v63  ;;  %v1591_v16 = vpop.f32.mrf.mxu0  ;;  %1605 = vmatprep.mubr.msk.f32.mxu1 %vm1657_vm4, %v1656_v43 }
 0x3a4   :  { %1599 = vmatprep.subr.mxu1 %v1656_v43 }
 0x3a5   :  { %1600 = vmatpush3.msra.mxu1 %v737_v2 }
 0x3a6   :  { %1601 = vmatprep.subr.mxu1 %v1656_v43 }
 0x3a7   :  { %1602 = vmatpush3.msra.mxu1 %v736_v3 }
 0x3a8   :  { %1603 = vmatprep.subr.mxu1 %v1656_v43 }
 0x3a9   :  { %1604 = vmatpush3.msra.mxu1 %v735_v4 }
 0x3aa   :  { %1606 = vmatmul.mubr.msk.f32.vlgmr.msra.gmra.mxu1 %vm740_vm2, %v1434_v17 }
 0x45a   :  { %v962_v19 = vpop.f32.mrf.mxu1 }
 0x45c   :  { %v1575_v20 = vpop.f32.mrf.mxu1 }
 0x45e   :  { %v1035_v21 = vpop.f32.mrf.mxu1 }
 0x45f   :  { %v1036_v22 = vadd.f32 %v1035_v21, %v962_v19 }
 0x460   :  { %v1580_v23 = vpop.f32.mrf.mxu1 }
 0x462   :  { %v1185_v24 = vpop.f32.mrf.mxu1 }
 0x463   :  { %v1189_v25 = vadd.f32 %v1185_v24, %v1036_v22 }
 0x464   :  { %v1596_v26 = vpop.f32.mrf.mxu1 }
 0x46a   :  { %v1261_v27 = vpop.f32.mrf.mxu1 }
 0x46b   :  { %1611 = vmatmul.mubr.msk.f32.vlgmr.msra.gmra.mxu0 %vm892_vm5, %v1261_v27 }
 0x46c   :  { %v1607_v28 = vpop.f32.mrf.mxu1 }
 0x52b   :  { %v1336_v29 = vpop.f32.mrf.mxu0 }
 0x52c   :  { %v1340_v31 = vadd.f32 %v1336_v29, %v1189_v25 }
 0x52d   :  { %v1612_v32 = vpop.f32.mrf.mxu0 }
 0x52e   :  { %v1348_v33 = vadd.f32 %v1438_v30, %v1340_v31 }
 0x530   :  { %v1349_v34 = vsel %vm740_vm2, %v1348_v33, 0.0 }
 0x531   :  { %1350 = vadd.xlane.f32.xlu1 %v1349_v34 }
 0x5ba   :  { %v1351_v35 = vpop.xlane.xlu1 %1350 }
 0x5bb   :  { %v1353_v36 = vmul.f32 0.03125, %v1351_v35 }
 0x5bd   :  { %v1354_v37 = vsub.f32 %v1348_v33, %v1353_v36 }
 0x5bf   :  { %v1355_v38 = vmul.f32 %v1354_v37, %v1354_v37 }
 0x5c1   :  { %v1356_v39 = vsel %vm740_vm2, %v1355_v38, 0.0 }
 0x5c2   :  { %1357 = vadd.xlane.f32.xlu0 %v1356_v39 }
 0x64b   :  { %v1358_v40 = vpop.xlane.xlu0 %1357 }
 0x64c   :  { %v1359_v41 = vmul.f32 0.03125, %v1358_v40 }
 0x64e   :  { %v1360_v42 = vadd.f32 1e-05, %v1359_v41 }
 0x650   :  { %1631 = vrsqrt.f32 %v1360_v42 }
 0x65d   :  { %v1632_v43 = vpop.eup %1631 }
 0x65e   :  { %v1362_v45 = vmul.f32 %v1632_v43, %v1354_v37 }
 0x660   :  { %v1370_v47 = vmul.f32 %v1439_v44, %v1362_v45 }
 0x662   :  { %v1378_v48 = vadd.f32 %v1440_v46, %v1370_v47 }
 0x664   :  { %1379 = vst.msk [vmem:[#allocation2] sm:$0xff] %vm740_vm2, %v1378_v48 }
 0x665   :  { %1644 = shalt.err (!%p1641_p4)
}
 0x666   :  { %1389 = dma.vmem_to_hbm [thread:$0]  %s1387_s11, 128, %s1898_s9, [#allocation3]  }
 0x667   :  { %1653 = dma.done.wait [#allocation3], 128  }
 0x668   :  { %1654 = vsyncadd [#allocation3], 4294967168 }
 0x669   :  { %1393 = vsyncpa [#allocation3], 1 }

</bundles_post_ra>
